<compile_context>
chip_gen: v5e
topology: v5e:2x2
jax: 0.10.0
libtpu: 0.0.40
codegen_flags: <defaults>
</compile_context>

<pallas_src>
import functools
import math

import jax
import jax.numpy as jnp
from jax.experimental import pallas as pl
from jax.experimental.pallas import tpu as pltpu


def _round_up(v, m):
    return (v + m - 1) // m * m


def _semantic_attention_kernel(x_ref, w1_ref, b1_ref, w2_ref, b2_ref, o_ref,
                               *, sub_rows, num_sub):
    # x_ref:  (TM, CP)   tile of packed rows (CP = pack * C, lane-dense)
    # w1_ref: (CP, RDP)  block-diagonal first Linear weight (bf16, transposed)
    # b1_ref: (1, RDP)   f32
    # w2_ref: (RDP, CP)  block-diagonal second Linear weight (bf16, transposed)
    # b2_ref: (1, CP)    f32
    # VMEM-resident params (constant (0,0) index maps): read once per grid step.
    w1 = w1_ref[...]
    w2 = w2_ref[...]
    b1 = b1_ref[...]
    b2 = b2_ref[...]

    def sub_chunk(s, carry):
        r0 = pl.multiple_of(s * sub_rows, sub_rows)
        rs = pl.ds(r0, sub_rows)
        x = x_ref[rs, :]                                      # (sub, CP)

        # Linear(C -> RD) + ReLU   (bf16 MXU operands, f32 accumulate)
        h = jnp.dot(x.astype(jnp.bfloat16), w1,
                    preferred_element_type=jnp.float32) + b1
        h = jnp.maximum(h, 0.0)

        # Linear(RD -> C) + Sigmoid (exp + approx reciprocal -> EUP slot)
        logits = jnp.dot(h.astype(jnp.bfloat16), w2,
                         preferred_element_type=jnp.float32) + b2
        attn = pl.reciprocal(1.0 + jnp.exp(-logits), approx=True)

        # Gate with the un-quantized input tile.
        o_ref[rs, :] = (x.astype(jnp.float32) * attn).astype(o_ref.dtype)
        return carry

    jax.lax.fori_loop(0, num_sub, sub_chunk, 0)


def pack_semantic_attention_params(w1t, b1, w2t, b2, *, max_packed_width=512):
    """Pre-pack the Linear params (hoisted out of the per-call jit path).

    w1t: [C, RD], b1: [1, RD], w2t: [RD, C], b2: [1, C]  (weights already
    stored as [in, out], i.e. the transpose of PyTorch's Linear.weight).

    Returns (w1p_bf16, b1p_f32, w2p_bf16, b2p_f32) where `pack` logical rows
    are packed side-by-side per 128-lane-aligned packed row and the weights
    are the matching block-diagonal kron(I_pack, W).
    """
    c, _rd = w1t.shape
    pack = 128 // math.gcd(c, 128)          # smallest pack with pack*c % 128 == 0
    if c % 128 == 0 or pack * c > max_packed_width:
        pack = 1                            # already lane-dense / awkward C: no packing
    if pack > 1:
        eye = jnp.eye(pack, dtype=jnp.float32)
        w1p = jnp.kron(eye, w1t.astype(jnp.float32))            # [CP, RDP]
        w2p = jnp.kron(eye, w2t.astype(jnp.float32))            # [RDP, CP]
        b1p = jnp.tile(b1.astype(jnp.float32), (1, pack))       # [1, RDP]
        b2p = jnp.tile(b2.astype(jnp.float32), (1, pack))       # [1, CP]
    else:
        w1p, w2p = w1t.astype(jnp.float32), w2t.astype(jnp.float32)
        b1p, b2p = b1.astype(jnp.float32), b2.astype(jnp.float32)
    # bf16 matmul operands: keeps v5e's MXU off the critical path; free elsewhere.
    return w1p.astype(jnp.bfloat16), b1p, w2p.astype(jnp.bfloat16), b2p


def _choose_tile(rows, tile_m):
    """Row-tile size: multiple of 8 (sublane), multiple of 512 when large so the
    in-kernel sub-chunk loop divides it, capped so the grid has >= 2 steps."""
    tile_m = max(512, _round_up(tile_m, 512))
    if rows >= 2 * tile_m:
        return tile_m
    half = -(-rows // 2)                    # cdiv(rows, 2): aim for >= 2 grid steps
    if half <= 512:
        return max(8, _round_up(half, 8))
    return _round_up(half, 512)


@functools.partial(jax.jit, static_argnames=("tile_m",))
def semantic_attention(x, w1p, b1p, w2p, b2p, *, tile_m=4096):
    """x: [N, C]; packed params from pack_semantic_attention_params."""
    n, c = x.shape
    cp, rdp = w1p.shape
    pack = cp // c

    # Minimal pad (< pack rows) only when N is not a multiple of `pack`.
    # The common aligned case is completely copy-free in the wrapper.
    rem = n % pack
    if rem:
        x = jnp.pad(x, ((0, pack - rem), (0, 0)))
    n_pack = x.shape[0]
    rows = n_pack // pack
    x_packed = x.reshape(rows, cp)          # free: row-major relabel, no data movement

    tm = _choose_tile(rows, tile_m)
    sub = tm if tm <= 512 else 512          # in-kernel sub-chunk: bounds temporaries
    num_sub = tm // sub
    grid = pl.cdiv(rows, tm)                # ragged last block masked by Pallas

    kernel = functools.partial(_semantic_attention_kernel,
                               sub_rows=sub, num_sub=num_sub)

    out_packed = pl.pallas_call(
        kernel,
        out_shape=jax.ShapeDtypeStruct((rows, cp), x.dtype),
        grid_spec=pltpu.PrefetchScalarGridSpec(
            num_scalar_prefetch=0,
            grid=(grid,),
            in_specs=[
                pl.BlockSpec((tm, cp), lambda i: (i, 0)),    # x packed-row tile
                pl.BlockSpec((cp, rdp), lambda i: (0, 0)),   # W1 block-diag (resident)
                pl.BlockSpec((1, rdp), lambda i: (0, 0)),    # b1
                pl.BlockSpec((rdp, cp), lambda i: (0, 0)),   # W2 block-diag (resident)
                pl.BlockSpec((1, cp), lambda i: (0, 0)),     # b2
            ],
            out_specs=pl.BlockSpec((tm, cp), lambda i: (i, 0)),
        ),
        compiler_params=pltpu.CompilerParams(
            # Row tiles are independent; on v7x use pltpu.CORE_PARALLEL to make
            # the 2-TensorCore split explicit (kept portable here).
            dimension_semantics=("parallel",),
        ),
    )(x_packed, w1p, b1p, w2p, b2p)

    out = out_packed.reshape(n_pack, c)     # free reshape back to [N_pack, C]
    if rem:
        out = out[:n]
    return out


def semantic_attention_ref(x, w1t, b1, w2t, b2):
    h = jnp.maximum(x @ w1t + b1, 0.0)
    attn = jax.nn.sigmoid(h @ w2t + b2)
    return x * attn


if __name__ == "__main__":
    channels = 32
    reduction_ratio = 4
    reduction_dim = max(1, channels // reduction_ratio)  # = 8

    key = jax.random.PRNGKey(0)
    kx, kw1, kb1, kw2, kb2, kx2, kx3 = jax.random.split(key, 7)

    # PyTorch Linear weights (W1 [rd, C], W2 [C, rd]) stored pre-transposed
    # as [in, out] for the kernel matmuls.
    w1t = jax.random.normal(kw1, (channels, reduction_dim), dtype=jnp.float32) * 0.1
    b1 = jax.random.normal(kb1, (1, reduction_dim), dtype=jnp.float32) * 0.1
    w2t = jax.random.normal(kw2, (reduction_dim, channels), dtype=jnp.float32) * 0.1
    b2 = jax.random.normal(kb2, (1, channels), dtype=jnp.float32) * 0.1

    # Weight packing hoisted out of the per-call path (runs once).
    packed = pack_semantic_attention_params(w1t, b1, w2t, b2)

    def check(x, tol=2e-2):  # bf16 matmuls + approx reciprocal -> loosened tolerance
        out = jax.block_until_ready(semantic_attention(x, *packed))
        ref = semantic_attention_ref(x, w1t, b1, w2t, b2)
        assert out.shape == x.shape and out.dtype == x.dtype
        err = float(jnp.max(jnp.abs(out - ref)))
        assert jnp.allclose(out, ref, atol=tol, rtol=tol), f"mismatch, max err {err}"

    # 1) N aligned to the 4-row lane packing (fully copy-free wrapper path).
    check(jax.random.normal(kx, (128, channels), dtype=jnp.float32))
    # 2) N not divisible by the lane packing (exercises the minimal-pad tail).
    check(jax.random.normal(kx2, (101, channels), dtype=jnp.float32))
    # 3) Larger N: exercises the in-kernel sub-chunk loop + ragged last grid block.
    check(jax.random.normal(kx3, (5000, channels), dtype=jnp.float32))

    print("KERNEL_OK")
</pallas_src>

<mosaic_0001>
module attributes {stable_mosaic.version = 11 : i64} {
  func.func @_semantic_attention_kernel(%arg0: i32, %arg1: memref<16x128xf32, #tpu.memory_space<vmem>>, %arg2: memref<128x32xbf16, #tpu.memory_space<vmem>>, %arg3: memref<1x32xf32, #tpu.memory_space<vmem>>, %arg4: memref<32x128xbf16, #tpu.memory_space<vmem>>, %arg5: memref<1x128xf32, #tpu.memory_space<vmem>>, %arg6: memref<16x128xf32, #tpu.memory_space<vmem>>) attributes {dimension_semantics = [#tpu.dimension_semantics<parallel>], iteration_bounds = array<i64: 2>, scalar_prefetch = 0 : i64, scratch_operands = 0 : i64, tpu.core_type = #tpu.core_type<tc>, window_params = [{transform_indices = @transform_0, window_bounds = array<i64: 16, 128>}, {pipeline_mode = #tpu.pipeline_mode<synchronous>, transform_indices = @transform_1, window_bounds = array<i64: 128, 32>}, {pipeline_mode = #tpu.pipeline_mode<synchronous>, transform_indices = @transform_2, window_bounds = array<i64: 1, 32>}, {pipeline_mode = #tpu.pipeline_mode<synchronous>, transform_indices = @transform_3, window_bounds = array<i64: 32, 128>}, {pipeline_mode = #tpu.pipeline_mode<synchronous>, transform_indices = @transform_4, window_bounds = array<i64: 1, 128>}, {transform_indices = @transform_5, window_bounds = array<i64: 16, 128>}]} {
    %c0 = arith.constant 0 : index
    %c0_0 = arith.constant 0 : index
    %0 = vector.load %arg2[%c0, %c0_0] : memref<128x32xbf16, #tpu.memory_space<vmem>>, vector<128x32xbf16>
    %c0_1 = arith.constant 0 : index
    %c0_2 = arith.constant 0 : index
    %1 = vector.load %arg4[%c0_1, %c0_2] : memref<32x128xbf16, #tpu.memory_space<vmem>>, vector<32x128xbf16>
    %c0_3 = arith.constant 0 : index
    %c0_4 = arith.constant 0 : index
    %2 = vector.load %arg3[%c0_3, %c0_4] : memref<1x32xf32, #tpu.memory_space<vmem>>, vector<1x32xf32>
    %c0_5 = arith.constant 0 : index
    %c0_6 = arith.constant 0 : index
    %3 = vector.load %arg5[%c0_5, %c0_6] : memref<1x128xf32, #tpu.memory_space<vmem>>, vector<1x128xf32>
    %c0_i32 = arith.constant 0 : i32
    %c16_i32 = arith.constant 16 : i32
    %4 = arith.muli %c0_i32, %c16_i32 : i32
    %5 = tpu.assume_multiple %4, 16 : i32
    %6 = arith.index_cast %5 : i32 to index
    %c0_7 = arith.constant 0 : index
    %7 = vector.load %arg1[%6, %c0_7] : memref<16x128xf32, #tpu.memory_space<vmem>>, vector<16x128xf32>
    %8 = arith.truncf %7 : vector<16x128xf32> to vector<16x128xbf16>
    %cst = arith.constant dense<0.000000e+00> : vector<16x32xf32>
    %9 = tpu.matmul %8, %0, %cst {dimension_numbers = #tpu.dot_dimension_numbers<[1], [0], [0], [1], [0, 0, 1, 1], [], []>} : vector<16x128xbf16>, vector<128x32xbf16>, vector<16x32xf32> -> vector<16x32xf32>
    %10 = vector.broadcast %2 : vector<1x32xf32> to vector<16x32xf32>
    %11 = arith.addf %9, %10 : vector<16x32xf32>
    %cst_8 = arith.constant 0.000000e+00 : f32
    %12 = vector.broadcast %cst_8 : f32 to vector<16x32xf32>
    %13 = arith.maximumf %11, %12 : vector<16x32xf32>
    %14 = arith.truncf %13 : vector<16x32xf32> to vector<16x32xbf16>
    %cst_9 = arith.constant dense<0.000000e+00> : vector<16x128xf32>
    %15 = tpu.matmul %14, %1, %cst_9 {dimension_numbers = #tpu.dot_dimension_numbers<[1], [0], [0], [1], [0, 0, 1, 1], [], []>} : vector<16x32xbf16>, vector<32x128xbf16>, vector<16x128xf32> -> vector<16x128xf32>
    %16 = vector.broadcast %3 : vector<1x128xf32> to vector<16x128xf32>
    %17 = arith.addf %15, %16 : vector<16x128xf32>
    %cst_10 = arith.constant 0.000000e+00 : f32
    %18 = vector.broadcast %cst_10 : f32 to vector<16x128xf32>
    %19 = arith.subf %18, %17 : vector<16x128xf32>
    %20 = math.exp %19 : vector<16x128xf32>
    %cst_11 = arith.constant 1.000000e+00 : f32
    %21 = vector.broadcast %cst_11 : f32 to vector<16x128xf32>
    %22 = arith.addf %21, %20 : vector<16x128xf32>
    %23 = tpu.reciprocal %22 {approx = true} : vector<16x128xf32> -> vector<16x128xf32>
    %24 = arith.mulf %7, %23 : vector<16x128xf32>
    %25 = arith.index_cast %5 : i32 to index
    %c0_12 = arith.constant 0 : index
    %26 = vector.load %arg6[%25, %c0_12] : memref<16x128xf32, #tpu.memory_space<vmem>>, vector<16x128xf32>
    tpu.vector_store %arg6[%25, %c0_12], %24 {strides = array<i32>} : memref<16x128xf32, #tpu.memory_space<vmem>>, vector<16x128xf32>,
    %c1_i32 = arith.constant 1 : i32
    return
  }
  func.func @transform_0(%arg0: i32) -> (i32, i32) {
    %c0_i32 = arith.constant 0 : i32
    %c0_i32_0 = arith.constant 0 : i32
    return %arg0, %c0_i32 : i32, i32
  }
  func.func @transform_1(%arg0: i32) -> (i32, i32) {
    %c0_i32 = arith.constant 0 : i32
    %c0_i32_0 = arith.constant 0 : i32
    %c0_i32_1 = arith.constant 0 : i32
    return %c0_i32, %c0_i32_0 : i32, i32
  }
  func.func @transform_2(%arg0: i32) -> (i32, i32) {
    %c0_i32 = arith.constant 0 : i32
    %c0_i32_0 = arith.constant 0 : i32
    %c0_i32_1 = arith.constant 0 : i32
    return %c0_i32, %c0_i32_0 : i32, i32
  }
  func.func @transform_3(%arg0: i32) -> (i32, i32) {
    %c0_i32 = arith.constant 0 : i32
    %c0_i32_0 = arith.constant 0 : i32
    %c0_i32_1 = arith.constant 0 : i32
    return %c0_i32, %c0_i32_0 : i32, i32
  }
  func.func @transform_4(%arg0: i32) -> (i32, i32) {
    %c0_i32 = arith.constant 0 : i32
    %c0_i32_0 = arith.constant 0 : i32
    %c0_i32_1 = arith.constant 0 : i32
    return %c0_i32, %c0_i32_0 : i32, i32
  }
  func.func @transform_5(%arg0: i32) -> (i32, i32) {
    %c0_i32 = arith.constant 0 : i32
    %c0_i32_0 = arith.constant 0 : i32
    return %arg0, %c0_i32 : i32, i32
  }
}

</mosaic_0001>

<bundles_post_ra>
// kernel: semantic_attention.1
= control target key start
LH: loop header
LB: loop body
LE: loop exit
PB: predicated region body
PF: predicated region fallthrough
CT: control target
= control target key end

     0   :  { %s543_s18 = smov 0   ;;  %s603_s0 = inlined_call_operand.vmem [shape: f32[32,128], index: 0, kind: input, shape index: {}]   ;;  %s604_s1 = inlined_call_operand.vmem [shape: bf16[128,32], index: 1, kind: input, shape index: {}]   ;;  %s605_s2 = inlined_call_operand.vmem [shape: f32[1,32], index: 2, kind: input, shape index: {}]   ;;  %s606_s3 = inlined_call_operand.vmem [shape: bf16[32,128], index: 3, kind: input, shape index: {}]   ;;  %s607_s4 = inlined_call_operand.vmem [shape: f32[1,128], index: 4, kind: input, shape index: {}]   ;;  %s608_s5 = inlined_call_operand.vmem [shape: f32[32,128], index: 5, kind: output, shape index: {}]  }
   0x1 LB: > { %s425_s19 = sadd.s32 4294967295, %s511_s18   ;;  %p429_p0 = scmp.ge.s32.totalorder %s511_s18, 1  ;;  %s511_s18 = sphi %s543_s18, %s15_s18  }
   0x2   : > { %p188_p1 = scmp.lt.s32.totalorder %s511_s18, 3 }
   0x4   : > { %p189_p2 = pnand %p429_p0, %p188_p1 }
   0x5   : > { %s430_s26 = sshll.u32 (!%p189_p2), %s425_s19, 1 }
   0x6   : > { %192 = sbr.rel (%p189_p2) target bundleno = 342 (0x156), region = 40  ;;  %p217_p3 = scmp.lt.s32.totalorder (!%p189_p2), %s430_s26, 3 }
   0xb   : > { %v484_v0 = vld [vmem:[%s604_s1 + $0x38] sm:$0xff]  ;;  %v483_v1 = vld [vmem:[%s604_s1 + $0x30] sm:$0xff]  ;;  %v482_v2 = vld [vmem:[%s604_s1 + $0x28] sm:$0xff]  ;;  %s610_s26 = smov (!%p217_p3, %s430_s26), 3  ;;  %vm337_vm0 = vcmask 261120  }
   0xc   : > { %305 = vmatpush.bf16.msra.mxu0 %v484_v0  ;;  %v481_v3 = vld [vmem:[%s604_s1 + $0x20] sm:$0xff]  ;;  %v480_v4 = vld [vmem:[%s604_s1 + $0x18] sm:$0xff]  ;;  %v479_v5 = vld [vmem:[%s604_s1 + $0x10] sm:$0xff]  ;;  %s431_s8 = sshll.u32 %s610_s26, 3 }
   0xd   : > { %v478_v6 = vld [vmem:[%s604_s1 + $0x8] sm:$0xff]  ;;  %s220_s13 = scalar_lea.vmem %s603_s0, %s431_s8  ;;  %v477_v7 = vld [vmem:[%s604_s1] sm:$0xff]  ;;  %s226_s28 = scalar_lea.vmem %s608_s5, %s431_s8 }
   0xe   : > { %v251_v8 = vld [vmem:[%s220_s13] sm:$0xff]  ;;  %v252_v9 = vld [vmem:[%s220_s13 + $0x8] sm:$0xff] }
   0xf   : > { %v253_v10 = vpack.c.bf16 %v252_v9, %v251_v8  ;;  %v486_v11 = vld [vmem:[%s606_s3 + $0x8] sm:$0xff]  ;;  %v485_v12 = vld [vmem:[%s606_s3] sm:$0xff] }
  0x10   : > { %306 = vmatpush.bf16.msra.mxu0 %v483_v1  ;;  %347 = vmatpush.bf16.msra.mxu1 %v486_v11  ;;  %v495_v14 = vld [vmem:[%s605_s2] ss:$0 sm:$0xff] }
  0x11   : > { %v496_v21 = vld [vmem:[%s607_s4] ss:$0 sm:$0xff] }
  0x14   : > { %307 = vmatpush.bf16.msra.mxu0 %v482_v2  ;;  %348 = vmatpush.bf16.msra.mxu1 %v485_v12 }
  0x18   : > { %308 = vmatpush.bf16.msra.mxu0 %v481_v3 }
  0x1c   : > { %309 = vmatpush.bf16.msra.mxu0 %v480_v4 }
  0x20   : > { %310 = vmatpush.bf16.msra.mxu0 %v479_v5 }
  0x24   : > { %311 = vmatpush.bf16.msra.mxu0 %v478_v6 }
  0x28   : > { %312 = vmatpush.bf16.msra.mxu0 %v477_v7 }
  0x2b   : > { %313 = vmatmul.bf16.vlgmr.msra.gmra.mxu0 %v253_v10 }
  0xa8   : > { %v314_v13 = vpop.f32.mrf.mxu0 }
  0xa9   : > { %v315_v15 = vadd.f32 %v495_v14, %v314_v13 }
  0xab   : > { %v319_v18 = vmax.f32 %v315_v15, 0.0 }
  0xb0   : > { %v316_v16 = vpop.f32.mrf.mxu0 }
  0xb1   : > { %v317_v17 = vadd.f32 %v495_v14, %v316_v16 }
  0xb3   : > { %v320_v19 = vmax.f32 %v317_v17, 0.0 }
  0xb5   : > { %v321_v20 = vpack.c.bf16 %v320_v19, %v319_v18 }
  0xb7   : > { %474 = vmatmul.msk.bf16.vlgmr.msra.gmra.mxu1 %vm337_vm0, %v321_v20 }
 0x134   : > { %v350_v22 = vpop.f32.mrf.mxu1 }
 0x135   : > { %v351_v23 = vadd.f32 %v496_v21, %v350_v22 }
 0x137   : > { %v355_v24 = vsub.f32 0.0, %v351_v23 }
 0x139   : > { %v357_v25 = vmul.f32 1.442695, %v355_v24 }
 0x13b   : > { %497 = vpow2.f32 %v357_v25 }
 0x13c   : > { %v352_v26 = vpop.f32.mrf.mxu1 }
 0x13d   : > { %v353_v27 = vadd.f32 %v496_v21, %v352_v26 }
 0x13f   : > { %v356_v28 = vsub.f32 0.0, %v353_v27 }
 0x141   : > { %v498_v29 = vpop.eup %497  ;;  %v359_v30 = vmul.f32 1.442695, %v356_v28 }
 0x142   : > { %v361_v31 = vadd.f32 1.0, %v498_v29 }
 0x143   : > { %499 = vpow2.f32 %v359_v30 }
 0x144   : > { %501 = vrcp.f32 %v361_v31 }
 0x149   : > { %v500_v32 = vpop.eup %499 }
 0x14a   : > { %v502_v33 = vpop.eup %501  ;;  %v362_v34 = vadd.f32 1.0, %v500_v32 }
 0x14b   : > { %v365_v35 = vmul.f32 %v502_v33, %v251_v8 }
 0x14c   : > { %503 = vrcp.f32 %v362_v34 }
 0x14d   : > { %367 = vst [vmem:[%s226_s28] sm:$0xff] %v365_v35 }
 0x152   : > { %v504_v36 = vpop.eup %503 }
 0x153   : > { %v366_v37 = vmul.f32 %v504_v36, %v252_v9 }
 0x155   : > { %368 = vst [vmem:[%s226_s28 + $0x8] sm:$0xff] %v366_v37 }
 0x156 PF: > { %s15_s18 = sadd.s32 1, %s511_s18  }
 0x157   : > { %p12_p4 = scmp.ge.s32.totalorder %s15_s18, 4  }
 0x159   :  { %14 = sbr.rel (!%p12_p4) target bundleno = 1 (0x1), region = 70 }

</bundles_post_ra>
